<compile_context>
chip_gen: v7x
topology: tpu7x:2x2x1
jax: 0.10.0
libtpu: 0.0.40
codegen_flags: <defaults>
</compile_context>

<pallas_src>
import functools

import jax
import jax.numpy as jnp
from jax.experimental import pallas as pl
from jax.experimental.pallas import tpu as pltpu


def _round_up(x, m):
    return (x + m - 1) // m * m


def _cores_per_chip():
    """2 on v7x (grid sharding across TensorCores pays off), else 1."""
    try:
        kind = jax.devices()[0].device_kind.lower()
    except Exception:
        return 1
    return 2 if "v7" in kind else 1


def _sigmoid_via_tanh(x):
    # sigmoid(x) == 0.5 * (1 + tanh(x / 2)): one EUP op instead of exp + divide.
    return 0.5 * (jnp.tanh(0.5 * x) + 1.0)


def _treelstm_kernel(h1_ref, h2_ref, c1_ref, c2_ref, w1_ref, w2_ref, b_ref,
                     h_out_ref, c_out_ref):
    compute_dtype = w1_ref.dtype  # bf16 (MXU-native) by default

    # Two K=dim MXU dots summed -- equivalent to cat(h1,h2) @ W, without
    # materializing the concatenated (bb, 2*dim) copy in VMEM.
    h1 = h1_ref[...].astype(compute_dtype)
    h2 = h2_ref[...].astype(compute_dtype)
    pre = jnp.dot(h1, w1_ref[...], preferred_element_type=jnp.float32)
    pre = pre + jnp.dot(h2, w2_ref[...], preferred_element_type=jnp.float32)
    pre = pre + b_ref[...].astype(jnp.float32)                 # (bb, 5*dim) f32

    d = h_out_ref.shape[-1]          # gate width; 128-lane aligned in this demo
    i_g  = pre[:, 0 * d:1 * d]
    f1_g = pre[:, 1 * d:2 * d]
    f2_g = pre[:, 2 * d:3 * d]
    o_g  = pre[:, 3 * d:4 * d]
    g_g  = pre[:, 4 * d:5 * d]

    c1 = c1_ref[...].astype(jnp.float32)
    c2 = c2_ref[...].astype(jnp.float32)

    sig = _sigmoid_via_tanh
    c = sig(f1_g) * c1 + sig(f2_g) * c2 + sig(i_g) * jnp.tanh(g_g)
    h = sig(o_g) * jnp.tanh(c)

    h_out_ref[...] = h.astype(h_out_ref.dtype)
    c_out_ref[...] = c.astype(c_out_ref.dtype)


def prepare_treelstm_params(weight, bias, *, compute_dtype=jnp.bfloat16):
    """Hoisted once-per-model weight prep (NOT redone per tree-node call).

    weight : (5*dim, 2*dim)  -- PyTorch nn.Linear layout
    bias   : (5*dim,)
    Returns (w1, w2, b2d):
      w1, w2 : (dim, 5*dim) in compute_dtype, so that
               h1 @ w1 + h2 @ w2 == cat(h1, h2) @ weight.T
      b2d    : (1, 5*dim) float32
    """
    _, in_dim = weight.shape
    dim = in_dim // 2
    w = jnp.transpose(weight)                     # (2*dim, 5*dim)
    w1 = w[:dim].astype(compute_dtype)            # multiplies h1
    w2 = w[dim:].astype(compute_dtype)            # multiplies h2
    b2d = bias.reshape(1, -1).astype(jnp.float32)
    return w1, w2, b2d


# Single-buffer grid-invariant blocks above this size (essential on v7x's
# 64 MiB VMEM once dim grows; irrelevant noise at dim=128).
_SINGLE_BUFFER_THRESHOLD = 8 * 1024 * 1024


def _invariant_spec(shape, nbytes):
    index_map = lambda i: (0,) * len(shape)
    if nbytes >= _SINGLE_BUFFER_THRESHOLD:
        try:
            return pl.BlockSpec(shape, index_map, pipeline_mode=pl.Buffered(1))
        except TypeError:  # older jax without pipeline_mode kwarg
            pass
    return pl.BlockSpec(shape, index_map)


@functools.partial(jax.jit, static_argnames=("block_b",))
def tree_lstm_forward(h1, c1, h2, c2, w1, w2, b2d, *, block_b=512):
    """Pallas TreeLSTM cell.

    h1, c1, h2, c2 : (B, dim) float32
    w1, w2         : (dim, 5*dim)  (from prepare_treelstm_params, bf16)
    b2d            : (1, 5*dim) float32
    returns (h, c) : each (B, dim)
    """
    B, dim = h1.shape
    assert dim % 128 == 0, "demo assumes lane-aligned dim (pad feature dim otherwise)"
    assert w1.shape == (dim, 5 * dim) and w2.shape == (dim, 5 * dim)
    # TODO(synk): for dim >~ 512 add a second grid axis tiling the 5*dim output
    # (N) dimension of the weight so VMEM stays bounded; single block is fine here.

    # Batch tile: large (512 rows) to amortize the ~0.35us per-step pipeline
    # overhead; 16-row granularity because matmul operands are bf16.
    bb = min(block_b, _round_up(B, 16))
    # v7x only: keep >= n_cores grid steps so the "parallel" batch axis shards
    # across both TensorCores.  On v5e/v6e (single TC) splitting is a pure loss.
    n_cores = _cores_per_chip()
    if n_cores > 1 and B >= n_cores * 16 and pl.cdiv(B, bb) < n_cores:
        bb = _round_up(pl.cdiv(B, n_cores), 16)
    Bp = _round_up(B, bb)

    # Zero-pad the batch instead of asserting divisibility; padded rows compute
    # harmless values and are sliced off below.
    if Bp != B:
        pad = ((0, Bp - B), (0, 0))
        h1 = jnp.pad(h1, pad)
        h2 = jnp.pad(h2, pad)
        c1 = jnp.pad(c1, pad)
        c2 = jnp.pad(c2, pad)

    grid = (Bp // bb,)

    act_spec = pl.BlockSpec((bb, dim), lambda i: (i, 0))
    w_bytes = dim * 5 * dim * w1.dtype.itemsize
    w_spec = _invariant_spec((dim, 5 * dim), w_bytes)
    b_spec = _invariant_spec((1, 5 * dim), 5 * dim * 4)

    # Explicit VMEM budget: double-buffered activation tiles + weight buffers +
    # f32 pre-activation intermediate, 2x headroom, floored at the 32 MiB default.
    act_bytes = bb * dim * h1.dtype.itemsize
    w_bufs = 1 if w_bytes >= _SINGLE_BUFFER_THRESHOLD else 2
    vmem_est = 6 * 2 * act_bytes + 2 * w_bufs * w_bytes + bb * 5 * dim * 4
    vmem_limit = int(min(max(2 * vmem_est, 32 * 1024 * 1024), 112 * 1024 * 1024))

    out_shapes = (
        jax.ShapeDtypeStruct((Bp, dim), h1.dtype),
        jax.ShapeDtypeStruct((Bp, dim), h1.dtype),
    )

    h, c = pl.pallas_call(
        _treelstm_kernel,
        out_shape=out_shapes,
        grid_spec=pltpu.PrefetchScalarGridSpec(
            num_scalar_prefetch=0,
            grid=grid,
            in_specs=[act_spec, act_spec, act_spec, act_spec,
                      w_spec, w_spec, b_spec],
            out_specs=[act_spec, act_spec],
        ),
        compiler_params=pltpu.CompilerParams(
            dimension_semantics=("parallel",),
            vmem_limit_bytes=vmem_limit),
    )(h1, h2, c1, c2, w1, w2, b2d)

    if Bp != B:
        h = h[:B]
        c = c[:B]
    return h, c


def tree_lstm_apply(params, x1, x2=None):
    """Mirrors TreeLSTM.forward's tuple / None handling around the kernel.

    NOTE: for real TreeLSTM workloads, stack all ready nodes of a tree level
    (or many trees) into one batch before calling — the single biggest lever.
    """
    w1, w2, b2d = params
    if not isinstance(x1, tuple):
        x1 = (x1, None)
    h1, c1 = x1
    if x2 is None:
        x2 = (jnp.zeros_like(h1), jnp.zeros_like(h1))
    elif not isinstance(x2, tuple):
        x2 = (x2, None)
    h2, c2 = x2
    if c1 is None:
        c1 = jnp.zeros_like(h1)
    if c2 is None:
        c2 = jnp.zeros_like(h2)
    return tree_lstm_forward(h1, c1, h2, c2, w1, w2, b2d)


def _reference(h1, c1, h2, c2, weight, bias):
    """Pure-JAX f32 reference matching the PyTorch forward."""
    concat = jnp.concatenate([h1, h2], axis=1)
    all_sum = concat @ weight.T + bias
    dim = h1.shape[1]
    i, f1, f2, o, g = [all_sum[:, k * dim:(k + 1) * dim] for k in range(5)]
    sig = jax.nn.sigmoid
    c = sig(f1) * c1 + sig(f2) * c2 + sig(i) * jnp.tanh(g)
    h = sig(o) * jnp.tanh(c)
    return h, c


if __name__ == "__main__":
    dim = 128      # TreeLSTM(dim) -- small, lane-aligned demo size
    batch = 8      # exercises the pad-to-16 (bf16 sublane) path

    key = jax.random.PRNGKey(0)
    k1, k2, k3, k4, kw, kb = jax.random.split(key, 6)

    h1 = jax.random.normal(k1, (batch, dim), dtype=jnp.float32)
    c1 = jax.random.normal(k2, (batch, dim), dtype=jnp.float32)
    h2 = jax.random.normal(k3, (batch, dim), dtype=jnp.float32)
    c2 = jax.random.normal(k4, (batch, dim), dtype=jnp.float32)

    # Deterministic init mimicking nn.Linear default: U(-1/sqrt(in), 1/sqrt(in))
    bound = 1.0 / jnp.sqrt(2.0 * dim)
    weight = jax.random.uniform(kw, (5 * dim, 2 * dim), jnp.float32,
                                minval=-bound, maxval=bound)
    bias = jax.random.uniform(kb, (5 * dim,), jnp.float32,
                              minval=-bound, maxval=bound)

    # Once-per-model prep: transpose, split, cast weight to bf16.
    params = prepare_treelstm_params(weight, bias)

    h, c = tree_lstm_apply(params, (h1, c1), (h2, c2))
    jax.block_until_ready((h, c))

    h_ref, c_ref = _reference(h1, c1, h2, c2, weight, bias)
    # Tolerance loosened vs. the pure-f32 path: matmul operands are bf16
    # (f32 accumulation); gate non-linearities keep the error well below 2e-2.
    assert jnp.allclose(h, h_ref, atol=2e-2, rtol=2e-2)
    assert jnp.allclose(c, c_ref, atol=2e-2, rtol=2e-2)

    print("KERNEL_OK")
</pallas_src>

<mosaic_0001>
module attributes {stable_mosaic.version = 11 : i64} {
  func.func @_treelstm_kernel(%arg0: i32, %arg1: memref<16x128xf32, #tpu.memory_space<vmem>>, %arg2: memref<16x128xf32, #tpu.memory_space<vmem>>, %arg3: memref<16x128xf32, #tpu.memory_space<vmem>>, %arg4: memref<16x128xf32, #tpu.memory_space<vmem>>, %arg5: memref<128x640xbf16, #tpu.memory_space<vmem>>, %arg6: memref<128x640xbf16, #tpu.memory_space<vmem>>, %arg7: memref<1x640xf32, #tpu.memory_space<vmem>>, %arg8: memref<16x128xf32, #tpu.memory_space<vmem>>, %arg9: memref<16x128xf32, #tpu.memory_space<vmem>>) attributes {dimension_semantics = [#tpu.dimension_semantics<parallel>], iteration_bounds = array<i64: 1>, scalar_prefetch = 0 : i64, scratch_operands = 0 : i64, tpu.core_type = #tpu.core_type<tc>, window_params = [{transform_indices = @transform_0, window_bounds = array<i64: 16, 128>}, {transform_indices = @transform_1, window_bounds = array<i64: 16, 128>}, {transform_indices = @transform_2, window_bounds = array<i64: 16, 128>}, {transform_indices = @transform_3, window_bounds = array<i64: 16, 128>}, {pipeline_mode = #tpu.pipeline_mode<synchronous>, transform_indices = @transform_4, window_bounds = array<i64: 128, 640>}, {pipeline_mode = #tpu.pipeline_mode<synchronous>, transform_indices = @transform_5, window_bounds = array<i64: 128, 640>}, {pipeline_mode = #tpu.pipeline_mode<synchronous>, transform_indices = @transform_6, window_bounds = array<i64: 1, 640>}, {transform_indices = @transform_7, window_bounds = array<i64: 16, 128>}, {transform_indices = @transform_8, window_bounds = array<i64: 16, 128>}]} {
    %c0 = arith.constant 0 : index
    %c0_0 = arith.constant 0 : index
    %0 = vector.load %arg1[%c0, %c0_0] : memref<16x128xf32, #tpu.memory_space<vmem>>, vector<16x128xf32>
    %1 = arith.truncf %0 : vector<16x128xf32> to vector<16x128xbf16>
    %c0_1 = arith.constant 0 : index
    %c0_2 = arith.constant 0 : index
    %2 = vector.load %arg2[%c0_1, %c0_2] : memref<16x128xf32, #tpu.memory_space<vmem>>, vector<16x128xf32>
    %3 = arith.truncf %2 : vector<16x128xf32> to vector<16x128xbf16>
    %c0_3 = arith.constant 0 : index
    %c0_4 = arith.constant 0 : index
    %4 = vector.load %arg5[%c0_3, %c0_4] : memref<128x640xbf16, #tpu.memory_space<vmem>>, vector<128x640xbf16>
    %cst = arith.constant dense<0.000000e+00> : vector<16x640xf32>
    %5 = tpu.matmul %1, %4, %cst {dimension_numbers = #tpu.dot_dimension_numbers<[1], [0], [0], [1], [0, 0, 1, 1], [], []>} : vector<16x128xbf16>, vector<128x640xbf16>, vector<16x640xf32> -> vector<16x640xf32>
    %c0_5 = arith.constant 0 : index
    %c0_6 = arith.constant 0 : index
    %6 = vector.load %arg6[%c0_5, %c0_6] : memref<128x640xbf16, #tpu.memory_space<vmem>>, vector<128x640xbf16>
    %cst_7 = arith.constant dense<0.000000e+00> : vector<16x640xf32>
    %7 = tpu.matmul %3, %6, %cst_7 {dimension_numbers = #tpu.dot_dimension_numbers<[1], [0], [0], [1], [0, 0, 1, 1], [], []>} : vector<16x128xbf16>, vector<128x640xbf16>, vector<16x640xf32> -> vector<16x640xf32>
    %8 = arith.addf %5, %7 : vector<16x640xf32>
    %c0_8 = arith.constant 0 : index
    %c0_9 = arith.constant 0 : index
    %9 = vector.load %arg7[%c0_8, %c0_9] : memref<1x640xf32, #tpu.memory_space<vmem>>, vector<1x640xf32>
    %10 = vector.broadcast %9 : vector<1x640xf32> to vector<16x640xf32>
    %11 = arith.addf %8, %10 : vector<16x640xf32>
    %12 = vector.extract_strided_slice %11 {offsets = [0, 0], sizes = [16, 128], strides = [1, 1]} : vector<16x640xf32> to vector<16x128xf32>
    %13 = vector.extract_strided_slice %11 {offsets = [0, 128], sizes = [16, 128], strides = [1, 1]} : vector<16x640xf32> to vector<16x128xf32>
    %14 = vector.extract_strided_slice %11 {offsets = [0, 256], sizes = [16, 128], strides = [1, 1]} : vector<16x640xf32> to vector<16x128xf32>
    %15 = vector.extract_strided_slice %11 {offsets = [0, 384], sizes = [16, 128], strides = [1, 1]} : vector<16x640xf32> to vector<16x128xf32>
    %16 = vector.extract_strided_slice %11 {offsets = [0, 512], sizes = [16, 128], strides = [1, 1]} : vector<16x640xf32> to vector<16x128xf32>
    %c0_10 = arith.constant 0 : index
    %c0_11 = arith.constant 0 : index
    %17 = vector.load %arg3[%c0_10, %c0_11] : memref<16x128xf32, #tpu.memory_space<vmem>>, vector<16x128xf32>
    %c0_12 = arith.constant 0 : index
    %c0_13 = arith.constant 0 : index
    %18 = vector.load %arg4[%c0_12, %c0_13] : memref<16x128xf32, #tpu.memory_space<vmem>>, vector<16x128xf32>
    %cst_14 = arith.constant 5.000000e-01 : f32
    %19 = vector.broadcast %cst_14 : f32 to vector<16x128xf32>
    %20 = arith.mulf %19, %13 : vector<16x128xf32>
    %21 = math.tanh %20 : vector<16x128xf32>
    %cst_15 = arith.constant 1.000000e+00 : f32
    %22 = vector.broadcast %cst_15 : f32 to vector<16x128xf32>
    %23 = arith.addf %21, %22 : vector<16x128xf32>
    %cst_16 = arith.constant 5.000000e-01 : f32
    %24 = vector.broadcast %cst_16 : f32 to vector<16x128xf32>
    %25 = arith.mulf %24, %23 : vector<16x128xf32>
    %26 = arith.mulf %25, %17 : vector<16x128xf32>
    %cst_17 = arith.constant 5.000000e-01 : f32
    %27 = vector.broadcast %cst_17 : f32 to vector<16x128xf32>
    %28 = arith.mulf %27, %14 : vector<16x128xf32>
    %29 = math.tanh %28 : vector<16x128xf32>
    %cst_18 = arith.constant 1.000000e+00 : f32
    %30 = vector.broadcast %cst_18 : f32 to vector<16x128xf32>
    %31 = arith.addf %29, %30 : vector<16x128xf32>
    %cst_19 = arith.constant 5.000000e-01 : f32
    %32 = vector.broadcast %cst_19 : f32 to vector<16x128xf32>
    %33 = arith.mulf %32, %31 : vector<16x128xf32>
    %34 = arith.mulf %33, %18 : vector<16x128xf32>
    %35 = arith.addf %26, %34 : vector<16x128xf32>
    %cst_20 = arith.constant 5.000000e-01 : f32
    %36 = vector.broadcast %cst_20 : f32 to vector<16x128xf32>
    %37 = arith.mulf %36, %12 : vector<16x128xf32>
    %38 = math.tanh %37 : vector<16x128xf32>
    %cst_21 = arith.constant 1.000000e+00 : f32
    %39 = vector.broadcast %cst_21 : f32 to vector<16x128xf32>
    %40 = arith.addf %38, %39 : vector<16x128xf32>
    %cst_22 = arith.constant 5.000000e-01 : f32
    %41 = vector.broadcast %cst_22 : f32 to vector<16x128xf32>
    %42 = arith.mulf %41, %40 : vector<16x128xf32>
    %43 = math.tanh %16 : vector<16x128xf32>
    %44 = arith.mulf %42, %43 : vector<16x128xf32>
    %45 = arith.addf %35, %44 : vector<16x128xf32>
    %cst_23 = arith.constant 5.000000e-01 : f32
    %46 = vector.broadcast %cst_23 : f32 to vector<16x128xf32>
    %47 = arith.mulf %46, %15 : vector<16x128xf32>
    %48 = math.tanh %47 : vector<16x128xf32>
    %cst_24 = arith.constant 1.000000e+00 : f32
    %49 = vector.broadcast %cst_24 : f32 to vector<16x128xf32>
    %50 = arith.addf %48, %49 : vector<16x128xf32>
    %cst_25 = arith.constant 5.000000e-01 : f32
    %51 = vector.broadcast %cst_25 : f32 to vector<16x128xf32>
    %52 = arith.mulf %51, %50 : vector<16x128xf32>
    %53 = math.tanh %45 : vector<16x128xf32>
    %54 = arith.mulf %52, %53 : vector<16x128xf32>
    %c0_26 = arith.constant 0 : index
    %c0_27 = arith.constant 0 : index
    %55 = vector.load %arg8[%c0_26, %c0_27] : memref<16x128xf32, #tpu.memory_space<vmem>>, vector<16x128xf32>
    tpu.vector_store %arg8[%c0_26, %c0_27], %54 {strides = array<i32>} : memref<16x128xf32, #tpu.memory_space<vmem>>, vector<16x128xf32>,
    %c0_28 = arith.constant 0 : index
    %c0_29 = arith.constant 0 : index
    %56 = vector.load %arg9[%c0_28, %c0_29] : memref<16x128xf32, #tpu.memory_space<vmem>>, vector<16x128xf32>
    tpu.vector_store %arg9[%c0_28, %c0_29], %45 {strides = array<i32>} : memref<16x128xf32, #tpu.memory_space<vmem>>, vector<16x128xf32>,
    return
  }
  func.func @transform_0(%arg0: i32) -> (i32, i32) {
    %c0_i32 = arith.constant 0 : i32
    %c0_i32_0 = arith.constant 0 : i32
    return %arg0, %c0_i32 : i32, i32
  }
  func.func @transform_1(%arg0: i32) -> (i32, i32) {
    %c0_i32 = arith.constant 0 : i32
    %c0_i32_0 = arith.constant 0 : i32
    return %arg0, %c0_i32 : i32, i32
  }
  func.func @transform_2(%arg0: i32) -> (i32, i32) {
    %c0_i32 = arith.constant 0 : i32
    %c0_i32_0 = arith.constant 0 : i32
    return %arg0, %c0_i32 : i32, i32
  }
  func.func @transform_3(%arg0: i32) -> (i32, i32) {
    %c0_i32 = arith.constant 0 : i32
    %c0_i32_0 = arith.constant 0 : i32
    return %arg0, %c0_i32 : i32, i32
  }
  func.func @transform_4(%arg0: i32) -> (i32, i32) {
    %c0_i32 = arith.constant 0 : i32
    %c0_i32_0 = arith.constant 0 : i32
    %c0_i32_1 = arith.constant 0 : i32
    return %c0_i32, %c0_i32_0 : i32, i32
  }
  func.func @transform_5(%arg0: i32) -> (i32, i32) {
    %c0_i32 = arith.constant 0 : i32
    %c0_i32_0 = arith.constant 0 : i32
    %c0_i32_1 = arith.constant 0 : i32
    return %c0_i32, %c0_i32_0 : i32, i32
  }
  func.func @transform_6(%arg0: i32) -> (i32, i32) {
    %c0_i32 = arith.constant 0 : i32
    %c0_i32_0 = arith.constant 0 : i32
    %c0_i32_1 = arith.constant 0 : i32
    return %c0_i32, %c0_i32_0 : i32, i32
  }
  func.func @transform_7(%arg0: i32) -> (i32, i32) {
    %c0_i32 = arith.constant 0 : i32
    %c0_i32_0 = arith.constant 0 : i32
    return %arg0, %c0_i32 : i32, i32
  }
  func.func @transform_8(%arg0: i32) -> (i32, i32) {
    %c0_i32 = arith.constant 0 : i32
    %c0_i32_0 = arith.constant 0 : i32
    return %arg0, %c0_i32 : i32, i32
  }
}

</mosaic_0001>

<bundles_post_ra>
// kernel: tree_lstm_forward.1
= control target key start
LH: loop header
LB: loop body
LE: loop exit
PB: predicated region body
PF: predicated region fallthrough
CT: control target
= control target key end

     0   :  { %14 = vsyncpa [#allocation3], 0  ;;  %s1413_s0 = inlined_call_operand.vmem [shape: f32[16,128], index: 0, kind: input, shape index: {}]   ;;  %s1414_s1 = inlined_call_operand.vmem [shape: f32[16,128], index: 1, kind: input, shape index: {}]   ;;  %s1415_s2 = inlined_call_operand.vmem [shape: f32[16,128], index: 2, kind: input, shape index: {}]   ;;  %s1416_s3 = inlined_call_operand.vmem [shape: f32[16,128], index: 3, kind: input, shape index: {}]   ;;  %s1417_s4 = inlined_call_operand.hbm [shape: bf16[128,640], index: 4, kind: input, shape index: {}]   ;;  %s1418_s5 = inlined_call_operand.hbm [shape: bf16[128,640], index: 5, kind: input, shape index: {}]   ;;  %s1419_s6 = inlined_call_operand.vmem [shape: f32[1,640], index: 6, kind: input, shape index: {}]   ;;  %s1420_s7 = inlined_call_operand.vmem [shape: f32[16,128], index: 7, kind: output, shape index: {0}]   ;;  %s1421_s8 = inlined_call_operand.vmem [shape: f32[16,128], index: 8, kind: output, shape index: {1}]  }
   0x1   :  { %15 = vsyncpa [#allocation5], 0  ;;  %s1269_s27 = smov [#allocation2]   ;;  %s1221_s9 = scalar_lea.hbm %s1417_s4, 5120 }
   0x2   :  { %s29_s28 = sshll.u32 %s1269_s27, 4  ;;  %p1222_p0 = scmp.ne.s32.totalorder %s1417_s4, %s1221_s9  ;;  %s30_s28 = int_to_ptr.vmem [resolvable:$true] %s29_s28 }
   0x3   :  { %p1225_p1 = scmp.lt.u32.totalorder %s1221_s9, %s1417_s4 }
   0x5   :  { %p1227_p2 = pnand %p1225_p1, %p1222_p0 }
   0x7   :  { %1230 = shalt.err (!%p1227_p2)
}
   0x8   :  { %s1231_s14 = scalar_lea.vmem %s30_s28, 5120  ;;  %p1236_p4 = scmp.lt.s32.totalorder %s30_s28, %s30_s28 }
   0x9   :  { %p1232_p3 = scmp.ne.s32.totalorder %s30_s28, %s1231_s14  ;;  %p1237_p5 = scmp.lt.s32.totalorder %s1231_s14, %s1231_s14 }
   0xb   :  { %p1238_p6 = por %p1237_p5, %p1236_p4 }
   0xd   :  { %p1239_p7 = pnand %p1238_p6, %p1232_p3 }
   0xf   :  { %1242 = shalt.err (!%p1239_p7)
}
  0x10   :  { %s1270_s15 = smov 320   ;;  %s1271_s16 = smov 20  }
  0x11   :  { %35 = dma.hbm_to_vmem [thread:$0]  %s1417_s4, 5120, %s30_s28, [#allocation3], %s1270_s15, %s1270_s15, %s1271_s16  }
  0x12   :  { %s1272_s19 = smov [#allocation4]   ;;  %s1243_s23 = scalar_lea.hbm %s1418_s5, 5120 }
  0x13   :  { %s41_s20 = sshll.u32 %s1272_s19, 4  ;;  %p1244_p8 = scmp.ne.s32.totalorder %s1418_s5, %s1243_s23  ;;  %s42_s20 = int_to_ptr.vmem [resolvable:$true] %s41_s20 }
  0x14   :  { %p1247_p9 = scmp.lt.u32.totalorder %s1243_s23, %s1418_s5 }
  0x16   :  { %p1249_p10 = pnand %p1247_p9, %p1244_p8 }
  0x18   :  { %1252 = shalt.err (!%p1249_p10)
}
  0x19   :  { %s1253_s29 = scalar_lea.vmem %s42_s20, 5120  ;;  %p1258_p12 = scmp.lt.s32.totalorder %s42_s20, %s42_s20 }
  0x1a   :  { %p1254_p11 = scmp.ne.s32.totalorder %s42_s20, %s1253_s29  ;;  %p1259_p13 = scmp.lt.s32.totalorder %s1253_s29, %s1253_s29 }
  0x1c   :  { %p1260_p0 = por %p1259_p13, %p1258_p12 }
  0x1e   :  { %p1261_p1 = pnand %p1260_p0, %p1254_p11 }
  0x20   :  { %1264 = shalt.err (!%p1261_p1)
}
  0x21   :  { %47 = dma.hbm_to_vmem [thread:$0]  %s1418_s5, 5120, %s42_s20, [#allocation5], %s1270_s15, %s1270_s15, %s1271_s16  }
  0x22   :  { %1265 = dma.done.wait [#allocation3], 5120  }
  0x23   :  { %1266 = vsyncadd [#allocation3], 4294962176 }
  0x24   :  { %1267 = dma.done.wait [#allocation5], 5120  }
  0x25   :  { %1268 = vsyncadd [#allocation5], 4294962176  ;;  %v1273_v0 = vmov 0   ;;  %v1085_v1 = vld [vmem:[#allocation4 + $0x4] ss:$20 sps:$4 sm:$0xff]   ;;  %v61_v34 = vld [vmem:[%s1414_s1 + $0x8] sm:$0xff] }
  0x26   :  { %399 = vmatprep.mubr.bf16.mxu0 %v1273_v0  ;;  %442 = vmatprep.mubr.bf16.mxu1 %v1273_v0  ;;  %v1087_v2 = vld [vmem:[#allocation4 + $0xc] ss:$20 sps:$4 sm:$0xff]   ;;  %v1090_v4 = vld [vmem:[#allocation4 + $0x8] ss:$20 sps:$4 sm:$0xff]   ;;  %v1096_v8 = vld [vmem:[#allocation4 + $0x30] ss:$20 sps:$4 sm:$0xff]  }
  0x27   :  { %367 = vmatprep.subr.bf16.mxu0 %v1085_v1  ;;  %v1089_v3 = vld [vmem:[#allocation4] ss:$20 sps:$4 sm:$0xff]   ;;  %410 = vmatprep.subr.bf16.mxu1 %v1087_v2  ;;  %v1095_v7 = vld [vmem:[#allocation4 + $0x28] ss:$20 sps:$4 sm:$0xff]   ;;  %v1101_v11 = vld [vmem:[#allocation4 + $0x50] ss:$20 sps:$4 sm:$0xff]  }
  0x28   :  { %v1091_v5 = vld [vmem:[#allocation4 + $0x2c] ss:$20 sps:$4 sm:$0xff]   ;;  %368 = vmatpush1.bf16.msra.mxu0 %v1089_v3  ;;  %411 = vmatpush1.bf16.msra.mxu1 %v1090_v4  ;;  %v1093_v6 = vld [vmem:[#allocation4 + $0x34] ss:$20 sps:$4 sm:$0xff]   ;;  %v1099_v10 = vld [vmem:[#allocation4 + $0x5c] ss:$20 sps:$4 sm:$0xff]  }
  0x29   :  { %369 = vmatprep.subr.bf16.mxu0 %v1091_v5  ;;  %412 = vmatprep.subr.bf16.mxu1 %v1093_v6  ;;  %v1097_v9 = vld [vmem:[#allocation4 + $0x54] ss:$20 sps:$4 sm:$0xff]   ;;  %v1102_v12 = vld [vmem:[#allocation4 + $0x58] ss:$20 sps:$4 sm:$0xff]   ;;  %v1103_v13 = vld [vmem:[#allocation4 + $0x7c] ss:$20 sps:$4 sm:$0xff]  }
  0x2a   :  { %v1105_v14 = vld [vmem:[#allocation4 + $0x84] ss:$20 sps:$4 sm:$0xff]   ;;  %v1108_v16 = vld [vmem:[#allocation4 + $0x80] ss:$20 sps:$4 sm:$0xff]   ;;  %v1114_v20 = vld [vmem:[#allocation4 + $0xa8] ss:$20 sps:$4 sm:$0xff]  }
  0x2b   :  { %v1107_v15 = vld [vmem:[#allocation4 + $0x78] ss:$20 sps:$4 sm:$0xff]   ;;  %v1113_v19 = vld [vmem:[#allocation4 + $0xa0] ss:$20 sps:$4 sm:$0xff]   ;;  %v1119_v23 = vld [vmem:[#allocation4 + $0xc8] ss:$20 sps:$4 sm:$0xff]  }
  0x2c   :  { %370 = vmatpush1.bf16.msra.mxu0 %v1095_v7  ;;  %413 = vmatpush1.bf16.msra.mxu1 %v1096_v8  ;;  %v1109_v17 = vld [vmem:[#allocation4 + $0xa4] ss:$20 sps:$4 sm:$0xff]   ;;  %v1111_v18 = vld [vmem:[#allocation4 + $0xac] ss:$20 sps:$4 sm:$0xff]   ;;  %v1117_v22 = vld [vmem:[#allocation4 + $0xd4] ss:$20 sps:$4 sm:$0xff]  }
  0x2d   :  { %371 = vmatprep.subr.bf16.mxu0 %v1097_v9  ;;  %414 = vmatprep.subr.bf16.mxu1 %v1099_v10  ;;  %v1115_v21 = vld [vmem:[#allocation4 + $0xcc] ss:$20 sps:$4 sm:$0xff]   ;;  %v1120_v24 = vld [vmem:[#allocation4 + $0xd0] ss:$20 sps:$4 sm:$0xff]   ;;  %v1121_v25 = vld [vmem:[#allocation4 + $0xf4] ss:$20 sps:$4 sm:$0xff]  }
  0x2e   :  { %v1123_v26 = vld [vmem:[#allocation4 + $0xfc] ss:$20 sps:$4 sm:$0xff]   ;;  %v1126_v28 = vld [vmem:[#allocation4 + $0xf8] ss:$20 sps:$4 sm:$0xff]   ;;  %v1132_v32 = vld [vmem:[#allocation4 + $0x120] ss:$20 sps:$4 sm:$0xff]  }
  0x2f   :  { %v1125_v27 = vld [vmem:[#allocation4 + $0xf0] ss:$20 sps:$4 sm:$0xff]   ;;  %v1131_v31 = vld [vmem:[#allocation4 + $0x118] ss:$20 sps:$4 sm:$0xff]   ;;  %v1133_v37 = vld [vmem:[#allocation2 + $0x8] ss:$20 sps:$4 sm:$0xff]  }
  0x30   :  { %372 = vmatpush1.bf16.msra.mxu0 %v1101_v11  ;;  %415 = vmatpush1.bf16.msra.mxu1 %v1102_v12  ;;  %v1127_v29 = vld [vmem:[#allocation4 + $0x11c] ss:$20 sps:$4 sm:$0xff]   ;;  %v1129_v30 = vld [vmem:[#allocation4 + $0x124] ss:$20 sps:$4 sm:$0xff]   ;;  %v1135_v35 = vld [vmem:[#allocation2 + $0xc] ss:$20 sps:$4 sm:$0xff]  }
  0x31   :  { %373 = vmatprep.subr.bf16.mxu0 %v1103_v13  ;;  %416 = vmatprep.subr.bf16.mxu1 %v1105_v14  ;;  %v60_v33 = vld [vmem:[%s1414_s1] sm:$0xff]  ;;  %v1274_v39 = vmov 0.0   ;;  %v1139_v40 = vld [vmem:[#allocation2 + $0x34] ss:$20 sps:$4 sm:$0xff]   ;;  %v1140_v42 = vld [vmem:[#allocation4 + $0x38] ss:$20 sps:$4 sm:$0xff]  }
  0x32   :  { %v1353_v36 = vpack.c.bf16 %v61_v34, %v60_v33  ;;  %v1136_v38 = vld [vmem:[#allocation4 + $0x10] ss:$20 sps:$4 sm:$0xff]   ;;  %vm1275_vm0 = vmmov 0   ;;  %v1141_v44 = vld [vmem:[#allocation2 + $0x58] ss:$20 sps:$4 sm:$0xff]  }
  0x33   :  { %v1137_v41 = vld [vmem:[#allocation2 + $0x30] ss:$20 sps:$4 sm:$0xff]   ;;  %v1144_v45 = vld [vmem:[#allocation4 + $0x60] ss:$20 sps:$4 sm:$0xff]   ;;  %v1148_v48 = vld [vmem:[#allocation4 + $0x88] ss:$20 sps:$4 sm:$0xff]  }
  0x34   :  { %374 = vmatpush1.bf16.msra.mxu0 %v1107_v15  ;;  %417 = vmatpush1.bf16.msra.mxu1 %v1108_v16  ;;  %v1143_v43 = vld [vmem:[#allocation2 + $0x5c] ss:$20 sps:$4 sm:$0xff]   ;;  %v1147_v46 = vld [vmem:[#allocation2 + $0x84] ss:$20 sps:$4 sm:$0xff]   ;;  %v1145_v47 = vld [vmem:[#allocation2 + $0x80] ss:$20 sps:$4 sm:$0xff]  }
  0x35   :  { %375 = vmatprep.subr.bf16.mxu0 %v1109_v17  ;;  %418 = vmatprep.subr.bf16.mxu1 %v1111_v18  ;;  %v1151_v49 = vld [vmem:[#allocation2 + $0xac] ss:$20 sps:$4 sm:$0xff]   ;;  %v1149_v50 = vld [vmem:[#allocation2 + $0xa8] ss:$20 sps:$4 sm:$0xff]   ;;  %v1152_v51 = vld [vmem:[#allocation4 + $0xb0] ss:$20 sps:$4 sm:$0xff]  }
  0x36   :  { %v1155_v52 = vld [vmem:[#allocation2 + $0xd4] ss:$20 sps:$4 sm:$0xff]   ;;  %v1153_v53 = vld [vmem:[#allocation2 + $0xd0] ss:$20 sps:$4 sm:$0xff]   ;;  %v1156_v54 = vld [vmem:[#allocation4 + $0xd8] ss:$20 sps:$4 sm:$0xff]  }
  0x37   :  { %v1159_v55 = vld [vmem:[#allocation2 + $0xfc] ss:$20 sps:$4 sm:$0xff]   ;;  %v1157_v56 = vld [vmem:[#allocation2 + $0xf8] ss:$20 sps:$4 sm:$0xff]   ;;  %v1160_v57 = vld [vmem:[#allocation4 + $0x100] ss:$20 sps:$4 sm:$0xff]  }
  0x38   :  { %376 = vmatpush1.bf16.msra.mxu0 %v1113_v19  ;;  %419 = vmatpush1.bf16.msra.mxu1 %v1114_v20  ;;  %v1163_v58 = vld [vmem:[#allocation2 + $0x124] ss:$20 sps:$4 sm:$0xff]   ;;  %v1161_v59 = vld [vmem:[#allocation2 + $0x120] ss:$20 sps:$4 sm:$0xff]   ;;  %v1164_v60 = vld [vmem:[#allocation4 + $0x128] ss:$20 sps:$4 sm:$0xff]  }
  0x39   :  { %377 = vmatprep.subr.bf16.mxu0 %v1115_v21  ;;  %420 = vmatprep.subr.bf16.mxu1 %v1117_v22  ;;  %v57_v61 = vld [vmem:[%s1413_s0] sm:$0xff]  ;;  %v58_v62 = vld [vmem:[%s1413_s0 + $0x8] sm:$0xff]  ;;  %v1179_v10 = vld [vmem:[#allocation2 + $0x7c] ss:$20 sps:$4 sm:$0xff]  }
  0x3a   :  { %v1167_v63 = vld [vmem:[#allocation2 + $0x4] ss:$20 sps:$4 sm:$0xff]   ;;  %v59_v1 = vpack.c.bf16 %v58_v62, %v57_v61  ;;  %v1165_v2 = vld [vmem:[#allocation2] ss:$20 sps:$4 sm:$0xff]   ;;  %v1169_v5 = vld [vmem:[#allocation2 + $0x28] ss:$20 sps:$4 sm:$0xff]  }
  0x3b   :  { %v1168_v3 = vld [vmem:[#allocation2 + $0x10] ss:$20 sps:$4 sm:$0xff]   ;;  %v1171_v4 = vld [vmem:[#allocation2 + $0x2c] ss:$20 sps:$4 sm:$0xff]   ;;  %v1175_v7 = vld [vmem:[#allocation2 + $0x54] ss:$20 sps:$4 sm:$0xff]  }
  0x3c   :  { %378 = vmatpush1.bf16.msra.mxu0 %v1119_v23  ;;  %421 = vmatpush1.bf16.msra.mxu1 %v1120_v24  ;;  %v1172_v6 = vld [vmem:[#allocation2 + $0x38] ss:$20 sps:$4 sm:$0xff]   ;;  %v1173_v8 = vld [vmem:[#allocation2 + $0x50] ss:$20 sps:$4 sm:$0xff]   ;;  %v1176_v9 = vld [vmem:[#allocation2 + $0x60] ss:$20 sps:$4 sm:$0xff]  }
  0x3d   :  { %379 = vmatprep.subr.bf16.mxu0 %v1121_v25  ;;  %422 = vmatprep.subr.bf16.mxu1 %v1123_v26  ;;  %v1177_v11 = vld [vmem:[#allocation2 + $0x78] ss:$20 sps:$4 sm:$0xff]   ;;  %v1180_v12 = vld [vmem:[#allocation2 + $0x88] ss:$20 sps:$4 sm:$0xff]   ;;  %v1184_v14 = vld [vmem:[#allocation2 + $0xb0] ss:$20 sps:$4 sm:$0xff]  }
  0x3e   :  { %v1183_v13 = vld [vmem:[#allocation2 + $0xa4] ss:$20 sps:$4 sm:$0xff]   ;;  %v1187_v15 = vld [vmem:[#allocation2 + $0xcc] ss:$20 sps:$4 sm:$0xff]   ;;  %v1185_v16 = vld [vmem:[#allocation2 + $0xc8] ss:$20 sps:$4 sm:$0xff]  }
  0x3f   :  { %v1188_v17 = vld [vmem:[#allocation2 + $0xd8] ss:$20 sps:$4 sm:$0xff]   ;;  %v1191_v18 = vld [vmem:[#allocation2 + $0xf4] ss:$20 sps:$4 sm:$0xff]   ;;  %v1189_v19 = vld [vmem:[#allocation2 + $0xf0] ss:$20 sps:$4 sm:$0xff]  }
  0x40   :  { %380 = vmatpush1.bf16.msra.mxu0 %v1125_v27  ;;  %423 = vmatpush1.bf16.msra.mxu1 %v1126_v28  ;;  %v1192_v20 = vld [vmem:[#allocation2 + $0x100] ss:$20 sps:$4 sm:$0xff]   ;;  %v1195_v21 = vld [vmem:[#allocation2 + $0x11c] ss:$20 sps:$4 sm:$0xff]   ;;  %v1193_v22 = vld [vmem:[#allocation2 + $0x118] ss:$20 sps:$4 sm:$0xff]  }
  0x41   :  { %381 = vmatprep.subr.bf16.mxu0 %v1127_v29  ;;  %424 = vmatprep.subr.bf16.mxu1 %v1129_v30  ;;  %v1196_v23 = vld [vmem:[#allocation2 + $0x128] ss:$20 sps:$4 sm:$0xff]  }
  0x44   :  { %382 = vmatpush1.bf16.msra.mxu0 %v1131_v31  ;;  %425 = vmatpush1.bf16.msra.mxu1 %v1132_v32  ;;  %v831_v32 = vlaneseq }
  0x45   :  { %1030 = vmatprep.subr.bf16.mxu0 %v1274_v39  ;;  %745 = vmatprep.subr.bf16.mxu1 %v1135_v35  ;;  %v829_v35 = vld [vmem:[%s1419_s6] sm:$0x1f] }
  0x46   :  { %v832_v33 = vshrl.u32 %v831_v32, 7  ;;  %v869_v32 = vld [vmem:[%s1416_s3 + $0x8] sm:$0xff] }
  0x47   :  { %400 = vmatmul.mubr.bf16.vlgmr.msra.gmra.mrb[0].mxu0 %v1353_v36  ;;  %443 = vmatmul.mubr.bf16.vlgmr.msra.gmra.mrb[0].mxu1 %v1353_v36 }
  0x48   :  { %1031 = vmatpush3.bf16.msra.mxu0 %v1136_v38  ;;  %746 = vmatpush1.bf16.msra.mxu1 %v1133_v37  ;;  %v841_v34 = vsub.s32 2, %v832_v33  ;;  %v833_v38 = vsub.s32 0, %v832_v33  ;;  %v845_v61 = vsub.s32 3, %v832_v33 }
  0x49   :  { %1032 = vmatprep.subr.bf16.mxu0 %v1274_v39  ;;  %747 = vmatprep.subr.bf16.mxu1 %v1139_v40 }
  0x4a   :  { %1046 = vmatprep.mubr.msk.bf16.mxu0 %vm1275_vm0, %v1274_v39  ;;  %777 = vmatprep.mubr.bf16.mxu1 %v1273_v0 }
  0x4c   :  { %1033 = vmatpush3.bf16.msra.mxu0 %v1140_v42  ;;  %748 = vmatpush1.bf16.msra.mxu1 %v1137_v41  ;;  %v834_v42 = vrot.slane %v829_v35, %v833_v38 }
  0x4d   :  { %1034 = vmatprep.subr.bf16.mxu0 %v1274_v39  ;;  %749 = vmatprep.subr.bf16.mxu1 %v1143_v43  ;;  %v849_v43 = vsub.s32 4, %v832_v33 }
  0x50   :  { %1035 = vmatpush3.bf16.msra.mxu0 %v1144_v45  ;;  %750 = vmatpush1.bf16.msra.mxu1 %v1141_v44 }
  0x51   :  { %1036 = vmatprep.subr.bf16.mxu0 %v1274_v39  ;;  %751 = vmatprep.subr.bf16.mxu1 %v1147_v46 }
  0x54   :  { %1037 = vmatpush3.bf16.msra.mxu0 %v1148_v48  ;;  %752 = vmatpush1.bf16.msra.mxu1 %v1145_v47 }
  0x55   :  { %1038 = vmatprep.subr.bf16.mxu0 %v1274_v39  ;;  %753 = vmatprep.subr.bf16.mxu1 %v1151_v49 }
  0x58   :  { %1039 = vmatpush3.bf16.msra.mxu0 %v1152_v51  ;;  %754 = vmatpush1.bf16.msra.mxu1 %v1149_v50  ;;  %v850_v50 = vrot.slane %v829_v35, %v849_v43 }
  0x59   :  { %1040 = vmatprep.subr.bf16.mxu0 %v1274_v39  ;;  %755 = vmatprep.subr.bf16.mxu1 %v1155_v52 }
  0x5c   :  { %1041 = vmatpush3.bf16.msra.mxu0 %v1156_v54  ;;  %756 = vmatpush1.bf16.msra.mxu1 %v1153_v53 }
  0x5d   :  { %1042 = vmatprep.subr.bf16.mxu0 %v1274_v39  ;;  %757 = vmatprep.subr.bf16.mxu1 %v1159_v55 }
  0x60   :  { %1043 = vmatpush3.bf16.msra.mxu0 %v1160_v57  ;;  %758 = vmatpush1.bf16.msra.mxu1 %v1157_v56 }
  0x61   :  { %1044 = vmatprep.subr.bf16.mxu0 %v1274_v39  ;;  %759 = vmatprep.subr.bf16.mxu1 %v1163_v58 }
  0x64   :  { %1045 = vmatpush3.bf16.msra.mxu0 %v1164_v60  ;;  %760 = vmatpush1.bf16.msra.mxu1 %v1161_v59 }
  0x65   :  { %702 = vmatprep.subr.bf16.mxu0 %v1167_v63  ;;  %1050 = vmatprep.subr.bf16.mxu1 %v1274_v39 }
  0x67   :  { %1047 = vmatmul.mubr.bf16.vlgmr.msra.gmra.mrb[4].mxu0 %v1353_v36  ;;  %778 = vmatmul.mubr.bf16.vlgmr.msra.gmra.mrb[0].mxu1 %v59_v1  ;;  %v842_v36 = vrot.slane %v829_v35, %v841_v34  ;;  %v867_v34 = vld [vmem:[%s1415_s2 + $0x8] sm:$0xff] }
  0x68   :  { %703 = vmatpush1.bf16.msra.mxu0 %v1165_v2  ;;  %1051 = vmatpush3.bf16.msra.mxu1 %v1168_v3 }
  0x69   :  { %704 = vmatprep.subr.bf16.mxu0 %v1171_v4  ;;  %1052 = vmatprep.subr.bf16.mxu1 %v1274_v39  ;;  %v846_v4 = vrot.slane %v829_v35, %v845_v61 }
  0x6a   :  { %734 = vmatprep.mubr.bf16.mxu0 %v1273_v0  ;;  %1066 = vmatprep.mubr.msk.bf16.mxu1 %vm1275_vm0, %v1274_v39  ;;  %v1181_v0 = vld [vmem:[#allocation2 + $0xa0] ss:$20 sps:$4 sm:$0xff]  }
  0x6c   :  { %705 = vmatpush1.bf16.msra.mxu0 %v1169_v5  ;;  %1053 = vmatpush3.bf16.msra.mxu1 %v1172_v6 }
  0x6d   :  { %706 = vmatprep.subr.bf16.mxu0 %v1175_v7  ;;  %1054 = vmatprep.subr.bf16.mxu1 %v1274_v39 }
  0x70   :  { %707 = vmatpush1.bf16.msra.mxu0 %v1173_v8  ;;  %1055 = vmatpush3.bf16.msra.mxu1 %v1176_v9 }
  0x71   :  { %708 = vmatprep.subr.bf16.mxu0 %v1179_v10  ;;  %1056 = vmatprep.subr.bf16.mxu1 %v1274_v39 }
  0x74   :  { %709 = vmatpush1.bf16.msra.mxu0 %v1177_v11  ;;  %1057 = vmatpush3.bf16.msra.mxu1 %v1180_v12 }
  0x75   :  { %710 = vmatprep.subr.bf16.mxu0 %v1183_v13  ;;  %1058 = vmatprep.subr.bf16.mxu1 %v1274_v39 }
  0x78   :  { %711 = vmatpush1.bf16.msra.mxu0 %v1181_v0  ;;  %1059 = vmatpush3.bf16.msra.mxu1 %v1184_v14 }
  0x79   :  { %712 = vmatprep.subr.bf16.mxu0 %v1187_v15  ;;  %1060 = vmatprep.subr.bf16.mxu1 %v1274_v39 }
  0x7c   :  { %713 = vmatpush1.bf16.msra.mxu0 %v1185_v16  ;;  %1061 = vmatpush3.bf16.msra.mxu1 %v1188_v17 }
  0x7d   :  { %714 = vmatprep.subr.bf16.mxu0 %v1191_v18  ;;  %1062 = vmatprep.subr.bf16.mxu1 %v1274_v39 }
  0x80   :  { %715 = vmatpush1.bf16.msra.mxu0 %v1189_v19  ;;  %1063 = vmatpush3.bf16.msra.mxu1 %v1192_v20  ;;  %v868_v20 = vld [vmem:[%s1416_s3] sm:$0xff] }
  0x81   :  { %716 = vmatprep.subr.bf16.mxu0 %v1195_v21  ;;  %1064 = vmatprep.subr.bf16.mxu1 %v1274_v39  ;;  %v837_v39 = vsub.s32 1, %v832_v33 }
  0x83   :  { %v838_v44 = vrot.slane %v829_v35, %v837_v39 }
  0x84   :  { %717 = vmatpush1.bf16.msra.mxu0 %v1193_v22  ;;  %1065 = vmatpush3.bf16.msra.mxu1 %v1196_v23  ;;  %v866_v22 = vld [vmem:[%s1415_s2] sm:$0xff] }
  0x87   :  { %735 = vmatmul.mubr.bf16.vlgmr.msra.gmra.mrb[0].mxu0 %v59_v1  ;;  %1067 = vmatmul.mubr.bf16.vlgmr.msra.gmra.mrb[4].mxu1 %v59_v1 }
 0x13a   :  { %v487_v24 = vpop.f32.mrb[4].mxu0  ;;  %v779_v25 = vpop.f32.mrb[0].mxu1 }
 0x13b   :  { %v1048_v26 = vpop.f32.mrb[5].mxu0  ;;  %v781_v27 = vpop.f32.mrb[1].mxu1  ;;  %v858_v37 = vadd.f32 %v842_v36, %v779_v25 }
 0x13c   :  { %v490_v28 = vpop.f32.mrb[6].mxu0  ;;  %v783_v29 = vpop.f32.mrb[2].mxu1  ;;  %v859_v7 = vadd.f32 %v846_v4, %v781_v27 }
 0x13d   :  { %v1049_v30 = vpop.f32.mrb[7].mxu0  ;;  %v785_v31 = vpop.f32.mrb[3].mxu1  ;;  %v863_v40 = vadd.f32 %v842_v36, %v783_v29  ;;  %v880_v41 = vmul.f32 0.5, %v858_v37 }
 0x13e   :  { %v864_v11 = vadd.f32 %v846_v4, %v785_v31  ;;  %v906_v12 = vmul.f32 0.5, %v859_v7 }
 0x13f   :  { %v881_v45 = vmul.f32 0.5, %v863_v40  ;;  %1197 = vtanh.f32 %v880_v41 }
 0x140   :  { %v907_v21 = vmul.f32 0.5, %v864_v11 }
 0x141   :  { %1199 = vtanh.f32 %v881_v45 }
 0x149   :  { %v1198_v6 = vpop.eup %1197 }
 0x14a   :  { %v884_v9 = vadd.f32 1.0, %v1198_v6 }
 0x14b   :  { %v1200_v8 = vpop.eup %1199 }
 0x14c   :  { %v885_v14 = vadd.f32 1.0, %v1200_v8  ;;  %v886_v16 = vmul.f32 0.5, %v884_v9 }
 0x14e   :  { %v887_v27 = vmul.f32 0.5, %v885_v14  ;;  %v888_v31 = vmul.f32 %v886_v16, %v868_v20 }
 0x150   :  { %v889_v38 = vmul.f32 %v887_v27, %v869_v32 }
 0x15a   :  { %v736_v46 = vpop.f32.mrb[0].mxu0  ;;  %v822_v47 = vpop.f32.mrb[4].mxu1 }
 0x15b   :  { %v856_v48 = vadd.f32 %v834_v42, %v736_v46  ;;  %v823_v49 = vadd.f32 %v822_v47, %v487_v24  ;;  %v738_v51 = vpop.f32.mrb[1].mxu0  ;;  %v1068_v52 = vpop.f32.mrb[5].mxu1 }
 0x15c   :  { %v857_v53 = vadd.f32 %v838_v44, %v738_v51  ;;  %v740_v54 = vpop.f32.mrb[2].mxu0  ;;  %v825_v55 = vpop.f32.mrb[6].mxu1 }
 0x15d   :  { %v892_v56 = vmul.f32 0.5, %v856_v48  ;;  %v861_v57 = vadd.f32 %v834_v42, %v740_v54  ;;  %v826_v58 = vadd.f32 %v825_v55, %v490_v28  ;;  %v742_v59 = vpop.f32.mrb[3].mxu0  ;;  %v1069_v60 = vpop.f32.mrb[7].mxu1  ;;  %v860_v1 = vadd.f32 %v850_v50, %v823_v49 }
 0x15e   :  { %v870_v62 = vmul.f32 0.5, %v857_v53  ;;  %v862_v63 = vadd.f32 %v838_v44, %v742_v59 }
 0x15f   :  { %1201 = vtanh.f32 %v892_v56  ;;  %v893_v2 = vmul.f32 0.5, %v861_v57  ;;  %v865_v5 = vadd.f32 %v850_v50, %v826_v58 }
 0x160   :  { %v871_v3 = vmul.f32 0.5, %v862_v63  ;;  %1203 = vtanh.f32 %v870_v62 }
 0x161   :  { %1205 = vtanh.f32 %v893_v2 }
 0x162   :  { %1207 = vtanh.f32 %v860_v1 }
 0x163   :  { %1209 = vtanh.f32 %v871_v3 }
 0x164   :  { %1211 = vtanh.f32 %v865_v5 }
 0x165   :  { %1213 = vtanh.f32 %v906_v12 }
 0x166   :  { %1215 = vtanh.f32 %v907_v21 }
 0x169   :  { %v1202_v10 = vpop.eup %1201 }
 0x16a   :  { %v896_v13 = vadd.f32 1.0, %v1202_v10  ;;  %v1204_v0 = vpop.eup %1203 }
 0x16b   :  { %v1206_v15 = vpop.eup %1205  ;;  %v874_v18 = vadd.f32 1.0, %v1204_v0 }
 0x16c   :  { %v898_v17 = vmul.f32 0.5, %v896_v13  ;;  %v1208_v19 = vpop.eup %1207  ;;  %v897_v23 = vadd.f32 1.0, %v1206_v15 }
 0x16d   :  { %v1210_v24 = vpop.eup %1209  ;;  %v876_v25 = vmul.f32 0.5, %v874_v18 }
 0x16e   :  { %v902_v26 = vmul.f32 %v1208_v19, %v898_v17  ;;  %v899_v28 = vmul.f32 0.5, %v897_v23  ;;  %v875_v29 = vadd.f32 1.0, %v1210_v24  ;;  %v1212_v30 = vpop.eup %1211 }
 0x16f   :  { %v878_v33 = vmul.f32 %v876_v25, %v866_v22  ;;  %v1214_v43 = vpop.eup %1213 }
 0x170   :  { %v877_v35 = vmul.f32 0.5, %v875_v29  ;;  %v903_v36 = vmul.f32 %v1212_v30, %v899_v28  ;;  %v1216_v44 = vpop.eup %1215  ;;  %v910_v45 = vadd.f32 1.0, %v1214_v43 }
 0x171   :  { %v890_v37 = vadd.f32 %v888_v31, %v878_v33  ;;  %v911_v46 = vadd.f32 1.0, %v1216_v44 }
 0x172   :  { %v879_v39 = vmul.f32 %v877_v35, %v867_v34  ;;  %v912_v47 = vmul.f32 0.5, %v910_v45 }
 0x173   :  { %v904_v40 = vadd.f32 %v902_v26, %v890_v37  ;;  %v913_v50 = vmul.f32 0.5, %v911_v46 }
 0x174   :  { %v891_v41 = vadd.f32 %v889_v38, %v879_v39 }
 0x175   :  { %1217 = vtanh.f32 %v904_v40  ;;  %920 = vst [vmem:[%s1421_s8] sm:$0xff] %v904_v40 }
 0x176   :  { %v905_v42 = vadd.f32 %v903_v36, %v891_v41 }
 0x178   :  { %1219 = vtanh.f32 %v905_v42  ;;  %921 = vst [vmem:[%s1421_s8 + $0x8] sm:$0xff] %v905_v42 }
 0x17f   :  { %v1218_v48 = vpop.eup %1217 }
 0x180   :  { %v916_v49 = vmul.f32 %v1218_v48, %v912_v47 }
 0x182   :  { %v1220_v51 = vpop.eup %1219  ;;  %918 = vst [vmem:[%s1420_s7] sm:$0xff] %v916_v49 }
 0x183   :  { %v917_v52 = vmul.f32 %v1220_v51, %v913_v50 }
 0x185   :  { %919 = vst [vmem:[%s1420_s7 + $0x8] sm:$0xff] %v917_v52 }
 0x186   :  { %930 = vsyncpa [#allocation3], 1 }
 0x187   :  { %931 = vsyncpa [#allocation5], 1 }

</bundles_post_ra>
